<compile_context>
chip_gen: v6e
topology: v6e:2x2x1
jax: 0.10.0
libtpu: 0.0.40
codegen_flags: <defaults>
</compile_context>

<pallas_src>
import functools

import jax
import jax.numpy as jnp
from jax.experimental import pallas as pl
from jax.experimental.pallas import tpu as pltpu

_VMEM_LIMIT = 64 * 1024 * 1024  # raise scoped VMEM above the 16/32 MiB defaults


def _pick_tile(n, cap):
    """Largest tile <= cap that is either the full dim or a multiple of 8 dividing n."""
    if n <= cap:
        return n
    best = None
    for d in range(8, cap + 1, 8):
        if n % d == 0:
            best = d
    return best if best is not None else n


# ----------------------------------------------------------------------------
# Row-tiled matmul + bias:  (N, K) @ (K, M) + (1, M)  — used for the hoisted
# input projection of every LSTM layer (one big MXU matmul per layer).
# ----------------------------------------------------------------------------
def _matmul_bias_kernel(x_ref, w_ref, b_ref, o_ref):
    o_ref[...] = (jnp.dot(x_ref[...], w_ref[...],
                          preferred_element_type=jnp.float32)
                  + b_ref[...]).astype(o_ref.dtype)


def matmul_bias(x2d, w, b, *, tile_m_cap=256):
    N, K = x2d.shape
    M = w.shape[-1]
    tile_m = _pick_tile(N, tile_m_cap)
    grid = (N // tile_m,)
    return pl.pallas_call(
        _matmul_bias_kernel,
        out_shape=jax.ShapeDtypeStruct((N, M), x2d.dtype),
        grid_spec=pltpu.PrefetchScalarGridSpec(
            num_scalar_prefetch=0,
            grid=grid,
            in_specs=[
                pl.BlockSpec((tile_m, K), lambda i: (i, 0)),
                pl.BlockSpec((K, M), lambda i: (0, 0)),
                pl.BlockSpec((1, M), lambda i: (0, 0)),
            ],
            out_specs=pl.BlockSpec((tile_m, M), lambda i: (i, 0)),
        ),
        compiler_params=pltpu.CompilerParams(
            dimension_semantics=("parallel",),
            vmem_limit_bytes=_VMEM_LIMIT),
    )(x2d, w, b)


# ----------------------------------------------------------------------------
# Recurrent LSTM kernel (intermediate layers): grid over time chunks,
# Tb time steps unrolled in-kernel, h/c carried in VMEM scratch.
# gates_x already contains x@W_ih + bias for all steps.
# ----------------------------------------------------------------------------
def _lstm_rec_kernel(gx_ref, h0_ref, c0_ref, whh_ref,
                     y_ref, hN_ref, cN_ref, h_sc, c_sc, *, Tb, H):
    t = pl.program_id(0)

    @pl.when(t == 0)
    def _():
        h_sc[...] = h0_ref[...].astype(jnp.float32)
        c_sc[...] = c0_ref[...].astype(jnp.float32)

    h = h_sc[...]
    c = c_sc[...]
    whh = whh_ref[...]
    # TODO(synk): gate slices are lane-aligned only when H % 128 == 0; pad H to 128
    # for large models to avoid cross-lane extraction per step.
    for s in range(Tb):
        gates = gx_ref[:, s, :].astype(jnp.float32) + jnp.dot(
            h, whh, preferred_element_type=jnp.float32)        # (B, 4H)
        i_g = jax.nn.sigmoid(gates[:, 0 * H:1 * H])
        f_g = jax.nn.sigmoid(gates[:, 1 * H:2 * H])
        g_g = jnp.tanh(gates[:, 2 * H:3 * H])
        o_g = jax.nn.sigmoid(gates[:, 3 * H:4 * H])
        c = f_g * c + i_g * g_g
        h = o_g * jnp.tanh(c)
        y_ref[:, s, :] = h.astype(y_ref.dtype)
    h_sc[...] = h
    c_sc[...] = c

    @pl.when(t == pl.num_programs(0) - 1)
    def _():
        hN_ref[...] = h.astype(hN_ref.dtype)
        cN_ref[...] = c.astype(cN_ref.dtype)


def lstm_recurrent(gates_x, h0, c0, w_hh, *, t_chunk_cap=32):
    """gates_x: (B, T, 4H) batch-first; returns y (B, T, H), h_T, c_T."""
    B, T, G = gates_x.shape
    H = h0.shape[-1]
    Tb = _pick_tile(T, t_chunk_cap)
    grid = (T // Tb,)
    kernel = functools.partial(_lstm_rec_kernel, Tb=Tb, H=H)
    return pl.pallas_call(
        kernel,
        out_shape=(jax.ShapeDtypeStruct((B, T, H), gates_x.dtype),
                   jax.ShapeDtypeStruct((B, H), gates_x.dtype),
                   jax.ShapeDtypeStruct((B, H), gates_x.dtype)),
        grid_spec=pltpu.PrefetchScalarGridSpec(
            num_scalar_prefetch=0,
            grid=grid,
            in_specs=[
                pl.BlockSpec((B, Tb, G), lambda t: (0, t, 0)),   # gates_x chunk
                pl.BlockSpec((B, H), lambda t: (0, 0)),          # h0
                pl.BlockSpec((B, H), lambda t: (0, 0)),          # c0
                pl.BlockSpec((H, G), lambda t: (0, 0)),          # W_hh (resident)
            ],
            out_specs=[
                pl.BlockSpec((B, Tb, H), lambda t: (0, t, 0)),   # y chunk
                pl.BlockSpec((B, H), lambda t: (0, 0)),          # h_T
                pl.BlockSpec((B, H), lambda t: (0, 0)),          # c_T
            ],
            scratch_shapes=[pltpu.VMEM((B, H), jnp.float32),     # h carry
                            pltpu.VMEM((B, H), jnp.float32)],    # c carry
        ),
        compiler_params=pltpu.CompilerParams(
            dimension_semantics=("arbitrary",),                  # time is sequential
            vmem_limit_bytes=_VMEM_LIMIT),
    )(gates_x, h0, c0, w_hh)


# ----------------------------------------------------------------------------
# Last layer: recurrence fused with the output Linear (out = h @ W_out + b_out),
# so the final (B, T, H) activation never round-trips HBM.
# ----------------------------------------------------------------------------
def _lstm_rec_out_kernel(gx_ref, h0_ref, c0_ref, whh_ref, wout_ref, bout_ref,
                         out_ref, hN_ref, cN_ref, h_sc, c_sc, o_sc, *, Tb, H):
    t = pl.program_id(0)

    @pl.when(t == 0)
    def _():
        h_sc[...] = h0_ref[...].astype(jnp.float32)
        c_sc[...] = c0_ref[...].astype(jnp.float32)

    h = h_sc[...]
    c = c_sc[...]
    whh = whh_ref[...]
    wout = wout_ref[...]
    for s in range(Tb):
        gates = gx_ref[:, s, :].astype(jnp.float32) + jnp.dot(
            h, whh, preferred_element_type=jnp.float32)
        i_g = jax.nn.sigmoid(gates[:, 0 * H:1 * H])
        f_g = jax.nn.sigmoid(gates[:, 1 * H:2 * H])
        g_g = jnp.tanh(gates[:, 2 * H:3 * H])
        o_g = jax.nn.sigmoid(gates[:, 3 * H:4 * H])
        c = f_g * c + i_g * g_g
        h = o_g * jnp.tanh(c)
        # projection is off the recurrent critical path; staged in VMEM scratch
        o_sc[:, s, :] = jnp.dot(h, wout, preferred_element_type=jnp.float32)
    h_sc[...] = h
    c_sc[...] = c
    # single dense store of the whole output chunk (bias added once per chunk)
    out_ref[...] = (o_sc[...] + bout_ref[...]).astype(out_ref.dtype)

    @pl.when(t == pl.num_programs(0) - 1)
    def _():
        hN_ref[...] = h.astype(hN_ref.dtype)
        cN_ref[...] = c.astype(cN_ref.dtype)


def lstm_recurrent_with_linear(gates_x, h0, c0, w_hh, w_out, b_out,
                               *, t_chunk_cap=32):
    B, T, G = gates_x.shape
    H = h0.shape[-1]
    O = w_out.shape[-1]
    Tb = _pick_tile(T, t_chunk_cap)
    grid = (T // Tb,)
    kernel = functools.partial(_lstm_rec_out_kernel, Tb=Tb, H=H)
    return pl.pallas_call(
        kernel,
        out_shape=(jax.ShapeDtypeStruct((B, T, O), gates_x.dtype),
                   jax.ShapeDtypeStruct((B, H), gates_x.dtype),
                   jax.ShapeDtypeStruct((B, H), gates_x.dtype)),
        grid_spec=pltpu.PrefetchScalarGridSpec(
            num_scalar_prefetch=0,
            grid=grid,
            in_specs=[
                pl.BlockSpec((B, Tb, G), lambda t: (0, t, 0)),   # gates_x chunk
                pl.BlockSpec((B, H), lambda t: (0, 0)),          # h0
                pl.BlockSpec((B, H), lambda t: (0, 0)),          # c0
                pl.BlockSpec((H, G), lambda t: (0, 0)),          # W_hh
                pl.BlockSpec((H, O), lambda t: (0, 0)),          # W_out
                pl.BlockSpec((1, O), lambda t: (0, 0)),          # b_out
            ],
            out_specs=[
                pl.BlockSpec((B, Tb, O), lambda t: (0, t, 0)),   # out chunk
                pl.BlockSpec((B, H), lambda t: (0, 0)),          # h_T
                pl.BlockSpec((B, H), lambda t: (0, 0)),          # c_T
            ],
            scratch_shapes=[pltpu.VMEM((B, H), jnp.float32),     # h carry
                            pltpu.VMEM((B, H), jnp.float32),     # c carry
                            pltpu.VMEM((B, Tb, O), jnp.float32)],  # out staging
        ),
        compiler_params=pltpu.CompilerParams(
            dimension_semantics=("arbitrary",),
            vmem_limit_bytes=_VMEM_LIMIT),
    )(gates_x, h0, c0, w_hh, w_out, b_out)


# ----------------------------------------------------------------------------
# Full module forward (batch_first throughout — no HBM transposes).
# ----------------------------------------------------------------------------
def lstm_module_forward(x, states, params):
    """x: (B, T, input_size); states = (h0, c0) each (num_layers, B, H)."""
    h0_all, c0_all = states
    B, T, _ = x.shape
    layers = params["lstm"]
    L = len(layers)

    cur = x                                            # (B, T, F) batch-first
    h_fs, c_fs = [], []
    out = None
    for layer, (w_ih, w_hh, bias) in enumerate(layers):
        in_sz = cur.shape[-1]
        H = w_hh.shape[0]
        # Hoisted input projection for ALL time steps: one big MXU matmul.
        gx = matmul_bias(cur.reshape(B * T, in_sz), w_ih, bias)
        gx = gx.reshape(B, T, 4 * H)
        if layer < L - 1:
            cur, h_T, c_T = lstm_recurrent(gx, h0_all[layer], c0_all[layer], w_hh)
        else:
            out, h_T, c_T = lstm_recurrent_with_linear(
                gx, h0_all[layer], c0_all[layer], w_hh,
                params["linear_w"], params["linear_b"])
        h_fs.append(h_T)
        c_fs.append(c_T)

    return out, (jnp.stack(h_fs, 0), jnp.stack(c_fs, 0))


# ----------------------------------------------------------------------------
# Pure-JAX reference (for correctness check).
# ----------------------------------------------------------------------------
def lstm_module_forward_ref(x, states, params):
    h0_all, c0_all = states
    num_layers = len(params["lstm"])
    seq = jnp.transpose(x, (1, 0, 2))                  # (T, B, I)
    h_fs, c_fs = [], []
    for layer in range(num_layers):
        w_ih, w_hh, bias = params["lstm"][layer]
        H = w_hh.shape[0]

        def step(carry, x_t):
            h, c = carry
            g = x_t @ w_ih + h @ w_hh + bias[0]
            i = jax.nn.sigmoid(g[:, 0 * H:1 * H])
            f = jax.nn.sigmoid(g[:, 1 * H:2 * H])
            gg = jnp.tanh(g[:, 2 * H:3 * H])
            o = jax.nn.sigmoid(g[:, 3 * H:4 * H])
            c_new = f * c + i * gg
            h_new = o * jnp.tanh(c_new)
            return (h_new, c_new), h_new

        (h_T, c_T), seq = jax.lax.scan(step, (h0_all[layer], c0_all[layer]), seq)
        h_fs.append(h_T)
        c_fs.append(c_T)
    out = seq @ params["linear_w"] + params["linear_b"][0]
    out = jnp.transpose(out, (1, 0, 2))
    return out, (jnp.stack(h_fs, 0), jnp.stack(c_fs, 0))


# ----------------------------------------------------------------------------
# Deterministic parameter construction (matches nn.LSTM / nn.Linear shapes).
# ----------------------------------------------------------------------------
def make_params(key, input_size, hidden_size, num_layers, output_size):
    params = {"lstm": []}
    scale = 1.0 / jnp.sqrt(hidden_size)
    for layer in range(num_layers):
        in_sz = input_size if layer == 0 else hidden_size
        key, k1, k2, k3, k4 = jax.random.split(key, 5)
        # PyTorch stores weight_ih as (4H, in); we pre-transpose to (in, 4H).
        w_ih = jax.random.uniform(k1, (in_sz, 4 * hidden_size), jnp.float32,
                                  -scale, scale)
        w_hh = jax.random.uniform(k2, (hidden_size, 4 * hidden_size), jnp.float32,
                                  -scale, scale)
        b_ih = jax.random.uniform(k3, (4 * hidden_size,), jnp.float32, -scale, scale)
        b_hh = jax.random.uniform(k4, (4 * hidden_size,), jnp.float32, -scale, scale)
        params["lstm"].append((w_ih, w_hh, (b_ih + b_hh)[None, :]))
    key, k5, k6 = jax.random.split(key, 3)
    params["linear_w"] = jax.random.uniform(
        k5, (hidden_size, output_size), jnp.float32, -scale, scale)
    params["linear_b"] = jax.random.uniform(
        k6, (1, output_size), jnp.float32, -scale, scale)
    return params


if __name__ == "__main__":
    # Small shapes: batch=2, seq=8, input_size=16, hidden_size=32,
    # num_layers=2, output_size=4.
    B, T, I, H, L, O = 2, 8, 16, 32, 2, 4

    key = jax.random.PRNGKey(0)
    key, kx = jax.random.split(key)
    x = jax.random.normal(kx, (B, T, I), jnp.float32)

    # init_hidden_states: zeros of shape (num_layers*directions, B, H)
    h0 = jnp.zeros((L, B, H), jnp.float32)
    c0 = jnp.zeros((L, B, H), jnp.float32)

    params = make_params(key, I, H, L, O)

    out, (h_n, c_n) = jax.block_until_ready(
        lstm_module_forward(x, (h0, c0), params))

    # correctness check against pure-JAX reference
    out_r, (h_r, c_r) = lstm_module_forward_ref(x, (h0, c0), params)
    assert out.shape == (B, T, O) and h_n.shape == (L, B, H) and c_n.shape == (L, B, H)
    assert jnp.allclose(out, out_r, atol=1e-5, rtol=1e-5)
    assert jnp.allclose(h_n, h_r, atol=1e-5, rtol=1e-5)
    assert jnp.allclose(c_n, c_r, atol=1e-5, rtol=1e-5)

    print("KERNEL_OK")
</pallas_src>

<mosaic_0001>
module attributes {stable_mosaic.version = 11 : i64} {
  func.func @_matmul_bias_kernel(%arg0: i32, %arg1: memref<16x16xf32, #tpu.memory_space<vmem>>, %arg2: memref<16x128xf32, #tpu.memory_space<vmem>>, %arg3: memref<1x128xf32, #tpu.memory_space<vmem>>, %arg4: memref<16x128xf32, #tpu.memory_space<vmem>>) attributes {dimension_semantics = [#tpu.dimension_semantics<parallel>], iteration_bounds = array<i64: 1>, scalar_prefetch = 0 : i64, scratch_operands = 0 : i64, tpu.core_type = #tpu.core_type<tc>, window_params = [{transform_indices = @transform_0, window_bounds = array<i64: 16, 16>}, {pipeline_mode = #tpu.pipeline_mode<synchronous>, transform_indices = @transform_1, window_bounds = array<i64: 16, 128>}, {pipeline_mode = #tpu.pipeline_mode<synchronous>, transform_indices = @transform_2, window_bounds = array<i64: 1, 128>}, {transform_indices = @transform_3, window_bounds = array<i64: 16, 128>}]} {
    %c0 = arith.constant 0 : index
    %c0_0 = arith.constant 0 : index
    %0 = vector.load %arg1[%c0, %c0_0] : memref<16x16xf32, #tpu.memory_space<vmem>>, vector<16x16xf32>
    %c0_1 = arith.constant 0 : index
    %c0_2 = arith.constant 0 : index
    %1 = vector.load %arg2[%c0_1, %c0_2] : memref<16x128xf32, #tpu.memory_space<vmem>>, vector<16x128xf32>
    %cst = arith.constant dense<0.000000e+00> : vector<16x128xf32>
    %2 = tpu.matmul %0, %1, %cst {dimension_numbers = #tpu.dot_dimension_numbers<[1], [0], [0], [1], [0, 0, 1, 1], [], []>} : vector<16x16xf32>, vector<16x128xf32>, vector<16x128xf32> -> vector<16x128xf32>
    %c0_3 = arith.constant 0 : index
    %c0_4 = arith.constant 0 : index
    %3 = vector.load %arg3[%c0_3, %c0_4] : memref<1x128xf32, #tpu.memory_space<vmem>>, vector<1x128xf32>
    %4 = vector.broadcast %3 : vector<1x128xf32> to vector<16x128xf32>
    %5 = arith.addf %2, %4 : vector<16x128xf32>
    %c0_5 = arith.constant 0 : index
    %c0_6 = arith.constant 0 : index
    %6 = vector.load %arg4[%c0_5, %c0_6] : memref<16x128xf32, #tpu.memory_space<vmem>>, vector<16x128xf32>
    tpu.vector_store %arg4[%c0_5, %c0_6], %5 {strides = array<i32>} : memref<16x128xf32, #tpu.memory_space<vmem>>, vector<16x128xf32>,
    return
  }
  func.func @transform_0(%arg0: i32) -> (i32, i32) {
    %c0_i32 = arith.constant 0 : i32
    %c0_i32_0 = arith.constant 0 : i32
    return %arg0, %c0_i32 : i32, i32
  }
  func.func @transform_1(%arg0: i32) -> (i32, i32) {
    %c0_i32 = arith.constant 0 : i32
    %c0_i32_0 = arith.constant 0 : i32
    %c0_i32_1 = arith.constant 0 : i32
    return %c0_i32, %c0_i32_0 : i32, i32
  }
  func.func @transform_2(%arg0: i32) -> (i32, i32) {
    %c0_i32 = arith.constant 0 : i32
    %c0_i32_0 = arith.constant 0 : i32
    %c0_i32_1 = arith.constant 0 : i32
    return %c0_i32, %c0_i32_0 : i32, i32
  }
  func.func @transform_3(%arg0: i32) -> (i32, i32) {
    %c0_i32 = arith.constant 0 : i32
    %c0_i32_0 = arith.constant 0 : i32
    return %arg0, %c0_i32 : i32, i32
  }
}

</mosaic_0001>

<bundles_post_ra>
// kernel: tpu_custom_call.1
= control target key start
LH: loop header
LB: loop body
LE: loop exit
PB: predicated region body
PF: predicated region fallthrough
CT: control target
= control target key end

     0   :  { %8 = vsyncpa [#allocation3], 0  ;;  %s287_s0 = inlined_call_operand.hbm [shape: f32[16,16], index: 0, kind: input, shape index: {}]   ;;  %s288_s1 = inlined_call_operand.hbm [shape: f32[16,128], index: 1, kind: input, shape index: {}]   ;;  %s289_s2 = inlined_call_operand.vmem [shape: f32[1,128], index: 2, kind: input, shape index: {}]   ;;  %s290_s3 = inlined_call_operand.hbm [shape: f32[16,128], index: 3, kind: output, shape index: {}]  }
   0x1   :  { %9 = vsyncpa [#allocation6], 0 }
   0x2   :  { %10 = vsyncpa [#allocation4], 0  ;;  %s241_s12 = smov [#allocation2]  }
   0x3   :  { %s16_s13 = sshll.u32 %s241_s12, 4  ;;  %s17_s13 = int_to_ptr.vmem [resolvable:$true] %s16_s13 }
   0x4   :  { %s183_s14 = scalar_lea.vmem %s17_s13, 256  ;;  %p188_p1 = scmp.lt.s32.totalorder %s17_s13, %s17_s13 }
   0x5   :  { %p184_p0 = scmp.ne.s32.totalorder %s17_s13, %s183_s14  ;;  %p189_p2 = scmp.lt.s32.totalorder %s183_s14, %s183_s14 }
   0x7   :  { %p190_p3 = por %p189_p2, %p188_p1 }
   0x9   :  { %p191_p4 = pnand %p190_p3, %p184_p0 }
   0xb   :  { %194 = shalt.err (!%p191_p4)
}
   0xc   :  { %s242_s15 = smov 128   ;;  %s243_s16 = smov 8  }
   0xd   :  { %22 = dma.hbm_to_vmem [thread:$0]  %s287_s0, 256, %s17_s13, [#allocation3], %s242_s15, %s242_s15, %s243_s16  }
   0xe   :  { %s244_s19 = smov [#allocation5]  }
   0xf   :  { %s28_s20 = sshll.u32 %s244_s19, 4  ;;  %s29_s20 = int_to_ptr.vmem [resolvable:$true] %s28_s20 }
  0x10   :  { %s203_s21 = scalar_lea.vmem %s29_s20, 256  ;;  %p208_p6 = scmp.lt.s32.totalorder %s29_s20, %s29_s20 }
  0x11   :  { %p204_p5 = scmp.ne.s32.totalorder %s29_s20, %s203_s21  ;;  %p209_p7 = scmp.lt.s32.totalorder %s203_s21, %s203_s21 }
  0x13   :  { %p210_p8 = por %p209_p7, %p208_p6 }
  0x15   :  { %p211_p9 = pnand %p210_p8, %p204_p5 }
  0x17   :  { %214 = shalt.err (!%p211_p9)
}
  0x18   :  { %34 = dma.hbm_to_vmem [thread:$0]  %s288_s1, 256, %s29_s20, [#allocation6], %s242_s15, %s242_s15, %s243_s16  }
  0x19   :  { %235 = dma.done.wait [#allocation3], 256  }
  0x1a   :  { %236 = vsyncadd [#allocation3], 4294967040 }
  0x1b   :  { %237 = dma.done.wait [#allocation6], 256  }
  0x1c   :  { %238 = vsyncadd [#allocation6], 4294967040  ;;  %vm54_vm0 = vcmask 130048   ;;  %v46_v0 = vld [vmem:[#allocation5 + $0x8] sm:$0xff]  ;;  %v45_v1 = vld [vmem:[#allocation5] sm:$0xff]  ;;  %s245_s1 = smov [#allocation7]  }
  0x1d   :  { %v43_v2 = vld [vmem:[#allocation2] sm:$0xff]  ;;  %163 = vmatprep.subr.mxu0 %v46_v0  ;;  %v44_v3 = vld [vmem:[#allocation2 + $0x8] sm:$0xff]  ;;  %s143_s25 = sshll.u32 %s245_s1, 4  ;;  %s144_s25 = int_to_ptr.vmem [resolvable:$true] %s143_s25 }
  0x1e   :  { %167 = vmatprep.mubr.msk.f32.mxu0 %vm54_vm0, %v43_v2  ;;  %164 = vmatpush3.msra.mxu0 %v46_v0  ;;  %v156_v4 = vld [vmem:[%s289_s2] ss:$0 sm:$0xff]  ;;  %s215_s26 = scalar_lea.vmem %s144_s25, 256  ;;  %p220_p11 = scmp.lt.s32.totalorder %s144_s25, %s144_s25 }
  0x1f   :  { %165 = vmatprep.subr.mxu0 %v45_v1  ;;  %p216_p10 = scmp.ne.s32.totalorder %s144_s25, %s215_s26  ;;  %p221_p12 = scmp.lt.s32.totalorder %s215_s26, %s215_s26 }
  0x20   :  { %166 = vmatpush3.msra.mxu0 %v45_v1 }
  0x21   :  { %168 = vmatmul.mubr.msk.f32.vlgmr.msra.gmra.mxu0 %vm54_vm0, %v44_v3  ;;  %p222_p13 = por %p221_p12, %p220_p11 }
  0x23   :  { %p223_p0 = pnand %p222_p13, %p216_p10 }
  0xe1   :  { %v169_v5 = vpop.f32.mrf.mxu0 }
  0xe2   :  { %v133_v6 = vadd.f32 %v169_v5, %v156_v4 }
  0xe3   :  { %v127_v7 = vpop.f32.mrf.mxu0 }
  0xe4   :  { %137 = vst [vmem:[#allocation7 + $0x8] sm:$0xff] %v133_v6  ;;  %v128_v8 = vadd.f32 %v156_v4, %v127_v7 }
  0xe6   :  { %136 = vst [vmem:[#allocation7] sm:$0xff] %v128_v8 }
  0xe7   :  { %226 = shalt.err (!%p223_p0)
}
  0xe8   :  { %149 = dma.vmem_to_hbm [thread:$0]  %s144_s25, 256, %s290_s3, [#allocation4], %s242_s15, %s242_s15, %s243_s16  }
  0xe9   :  { %239 = dma.done.wait [#allocation4], 256  }
  0xea   :  { %240 = vsyncadd [#allocation4], 4294967040 }
  0xeb   :  { %153 = vsyncpa [#allocation3], 1 }
  0xec   :  { %154 = vsyncpa [#allocation6], 1 }
  0xed   :  { %155 = vsyncpa [#allocation4], 1 }

</bundles_post_ra>
